<compile_context>
chip_gen: v7x
topology: tpu7x:2x2x1
jax: 0.10.0
libtpu: 0.0.40
codegen_flags: <defaults>
</compile_context>

<pallas_src>
import math

import jax
import jax.numpy as jnp
from jax import lax
from jax.experimental import pallas as pl
from jax.experimental.pallas import tpu as pltpu

# Real layer sizes from the PyTorch module
IN_DIM = 2        # observation
H1_DIM = 32       # affine
H2_DIM = 8        # affine_2
ACT_DIM = 2       # action_layer -> (mean, std)
VAL_DIM = 1       # value_layer
HEAD_DIM = ACT_DIM + VAL_DIM     # fused action + value head

# TPU-friendly sizes
TILE_B = 8        # batch rows per sublane tile
PAD_F = 128       # lane width of every VMEM slab

# Packed parameter-slab layout (rows):
#   0 : W1[0, :]            (lanes 0..31)
#   1 : W1[1, :]            (lanes 0..31)
#   2 : b1                  (lanes 0..31)
#   3 : b2                  (lanes 0..7)
#   4 : fused head bias     (lanes 0..2 = [b_mean, b_std, b_value])
#   5..7   : zero padding
#   8..39  : W2  (32 x 8 real, lanes 0..7)
#   40..47 : WH  (8 x 3 real, lanes 0..2 = [mean, std, value] columns)
W2_ROW = 8
WH_ROW = 40
SLAB_ROWS = 48

LOG_2PI = math.log(2.0 * math.pi)


# ---------------------------------------------------------------------------
# Pallas kernel: MLP + fused head + Normal sample + log_prob (per batch row)
# ---------------------------------------------------------------------------
def actor_critic_kernel(state_ref, slab_ref, out_ref):
    # state_ref : (TILE_B, PAD_F) f32 -- lane0=obs0, lane1=obs1, lane2=eps
    # slab_ref  : (SLAB_ROWS, PAD_F)  -- packed parameters (layout above)
    # out_ref   : (TILE_B, PAD_F)     -- lane0=action, lane1=log_prob, lane2=value
    st = state_ref[...]
    lane = lax.broadcasted_iota(jnp.int32, (TILE_B, PAD_F), 1)

    # Per-row lane extraction via masked row-sums (keepdims) -- cheap XLU row
    # reductions, batch-correct, and robust to lower (no cross-sublane
    # reductions or scalar re-broadcasts like the old epilogue).
    def col(v, j):
        return jnp.sum(jnp.where(lane == j, v, 0.0), axis=1, keepdims=True)

    x0, x1, eps = col(st, 0), col(st, 1), col(st, 2)       # (TILE_B, 1) each

    # Layer 1 (2 -> 32) on the VPU: two broadcast FMAs, no MXU pass.
    w1_0 = slab_ref[0:1, :]
    w1_1 = slab_ref[1:2, :]
    b1 = slab_ref[2:3, :]
    h1 = jnp.tanh(x0 * w1_0 + x1 * w1_1 + b1)              # lanes >= 32 are 0

    # Layer 2 (32 -> 8) on the MXU, contracting over the real width 32.
    w2 = slab_ref[W2_ROW:W2_ROW + H1_DIM, :]               # (32, 128)
    b2 = slab_ref[3:4, :]
    h2 = jnp.tanh(
        jnp.dot(h1[:, :H1_DIM], w2, preferred_element_type=jnp.float32) + b2)

    # Fused head (8 -> [mean, std, value]) on the MXU.
    wh = slab_ref[WH_ROW:WH_ROW + H2_DIM, :]               # (8, 128)
    bh = slab_ref[4:5, :]
    hd = (jnp.dot(h2[:, :H2_DIM], wh, preferred_element_type=jnp.float32)
          + bh)                                            # lane0=mean, 1=std, 2=value

    # Normal(mean, std): per-row sample + log_prob.
    mean = col(hd, 0)
    std = col(hd, 1)
    action = mean + std * eps
    # log_prob(sample) = -eps^2/2 - log(std) - log(sqrt(2*pi))
    # TODO(synk): torch.distributions.Normal requires scale > 0; like the raw
    # module output we accept any std and use log(|std|) (std == 0 -> -inf).
    logp = -0.5 * (eps * eps) - jnp.log(jnp.abs(std)) - 0.5 * LOG_2PI

    out_ref[...] = jnp.where(lane == 0, action,
                             jnp.where(lane == 1, logp, hd))


# ---------------------------------------------------------------------------
# Wrappers
# ---------------------------------------------------------------------------
@jax.jit
def actor_critic_forward(obs, eps, slab):
    """obs: (B, 2) f32; eps: (B,) standard-normal noise; slab: packed params.

    Returns (B, 3) f32: [:, 0]=sampled action, [:, 1]=log_prob, [:, 2]=value.
    """
    b = obs.shape[0]
    n_tiles = (b + TILE_B - 1) // TILE_B
    bp = n_tiles * TILE_B
    # Pack obs + eps into one lane-dense state slab (amortized over the batch).
    state = jnp.zeros((bp, PAD_F), jnp.float32)
    state = state.at[:b, 0].set(obs[:, 0].astype(jnp.float32))
    state = state.at[:b, 1].set(obs[:, 1].astype(jnp.float32))
    state = state.at[:b, 2].set(eps.astype(jnp.float32))

    out = pl.pallas_call(
        actor_critic_kernel,
        out_shape=jax.ShapeDtypeStruct((bp, PAD_F), jnp.float32),
        grid=(n_tiles,),
        in_specs=[
            pl.BlockSpec((TILE_B, PAD_F), lambda i: (i, 0)),      # state tile
            pl.BlockSpec((SLAB_ROWS, PAD_F), lambda i: (0, 0)),   # params, resident
        ],
        out_specs=pl.BlockSpec((TILE_B, PAD_F), lambda i: (i, 0)),
        compiler_params=pltpu.CompilerParams(
            dimension_semantics=("parallel",)),   # v7x: both TCs split the batch
    )(state, slab)
    return out[:b, :HEAD_DIM]


def actor_critic_step(observation, slab, eps):
    """Single-observation path mirroring ActorCritic.forward.
    observation: (2,) f32; eps: scalar standard-normal noise."""
    out = actor_critic_forward(observation.reshape(1, IN_DIM),
                               jnp.reshape(eps, (1,)), slab)
    return out[0, 0], out[0, 1], out[0, 2]


# ---------------------------------------------------------------------------
# Parameter init (mimics nn.Linear default U(-1/sqrt(fan_in), +1/sqrt(fan_in)))
# and packing into the single slab
# ---------------------------------------------------------------------------
def init_linear(key, fan_in, fan_out):
    kw, kb = jax.random.split(key)
    bound = 1.0 / math.sqrt(fan_in)
    w = jax.random.uniform(kw, (fan_in, fan_out), jnp.float32, -bound, bound)
    b = jax.random.uniform(kb, (fan_out,), jnp.float32, -bound, bound)
    return w, b


def pack_params(w1, b1, w2, b2, wa, ba, wv, bv):
    slab = jnp.zeros((SLAB_ROWS, PAD_F), jnp.float32)
    slab = slab.at[0, :H1_DIM].set(w1[0])
    slab = slab.at[1, :H1_DIM].set(w1[1])
    slab = slab.at[2, :H1_DIM].set(b1)
    slab = slab.at[3, :H2_DIM].set(b2)
    slab = slab.at[4, :ACT_DIM].set(ba)
    slab = slab.at[4, ACT_DIM:HEAD_DIM].set(bv)
    slab = slab.at[W2_ROW:W2_ROW + H1_DIM, :H2_DIM].set(w2)
    slab = slab.at[WH_ROW:WH_ROW + H2_DIM, :ACT_DIM].set(wa)
    slab = slab.at[WH_ROW:WH_ROW + H2_DIM, ACT_DIM:HEAD_DIM].set(wv)
    return slab


if __name__ == "__main__":
    key = jax.random.PRNGKey(0)
    k_obs, k1, k2, k3, k4, k_eps = jax.random.split(key, 6)

    # deterministic parameters
    w1, b1 = init_linear(k1, IN_DIM, H1_DIM)    # affine:        2 -> 32
    w2, b2 = init_linear(k2, H1_DIM, H2_DIM)    # affine_2:     32 -> 8
    wa, ba = init_linear(k3, H2_DIM, ACT_DIM)   # action_layer:  8 -> 2
    wv, bv = init_linear(k4, H2_DIM, VAL_DIM)   # value_layer:   8 -> 1
    slab = pack_params(w1, b1, w2, b2, wa, ba, wv, bv)

    batch = 12                                  # exercises 2 batch tiles on the grid
    obs = jax.random.normal(k_obs, (batch, IN_DIM), jnp.float32)
    eps = jax.random.normal(k_eps, (batch,), jnp.float32)   # Normal sample noise

    out = actor_critic_forward(obs, eps, slab)
    jax.block_until_ready(out)
    action, log_prob, value = out[:, 0], out[:, 1], out[:, 2]

    # pure-JAX reference of the full forward path
    mm = lambda a, b: jnp.dot(a, b, precision=lax.Precision.HIGHEST)
    h1r = jnp.tanh(mm(obs, w1) + b1)
    h2r = jnp.tanh(mm(h1r, w2) + b2)
    apr = mm(h2r, wa) + ba                      # (B, 2): [mean, std]
    ref_value = (mm(h2r, wv) + bv)[:, 0]
    mean_r, std_r = apr[:, 0], apr[:, 1]
    ref_action = mean_r + std_r * eps
    ref_logp = (-((ref_action - mean_r) ** 2) / (2.0 * std_r ** 2)
                - jnp.log(jnp.abs(std_r)) - 0.5 * LOG_2PI)

    assert jnp.allclose(action, ref_action, atol=1e-4), (action, ref_action)
    assert jnp.allclose(value, ref_value, atol=1e-4), (value, ref_value)
    assert jnp.allclose(log_prob, ref_logp, atol=1e-3), (log_prob, ref_logp)

    # single-observation path (the module's actual forward signature)
    a0, lp0, v0 = actor_critic_step(obs[0], slab, eps[0])
    jax.block_until_ready((a0, lp0, v0))
    assert jnp.allclose(a0, ref_action[0], atol=1e-4), (a0, ref_action[0])
    assert jnp.allclose(lp0, ref_logp[0], atol=1e-3), (lp0, ref_logp[0])
    assert jnp.allclose(v0, ref_value[0], atol=1e-4), (v0, ref_value[0])

    print("KERNEL_OK")
</pallas_src>

<mosaic_0001>
module attributes {stable_mosaic.version = 11 : i64} {
  func.func @actor_critic_kernel(%arg0: i32, %arg1: memref<8x128xf32, #tpu.memory_space<vmem>>, %arg2: memref<48x128xf32, #tpu.memory_space<vmem>>, %arg3: memref<8x128xf32, #tpu.memory_space<vmem>>) attributes {dimension_semantics = [#tpu.dimension_semantics<parallel>], iteration_bounds = array<i64: 2>, scalar_prefetch = 0 : i64, scratch_operands = 0 : i64, tpu.core_type = #tpu.core_type<tc>, window_params = [{transform_indices = @transform_0, window_bounds = array<i64: 8, 128>}, {pipeline_mode = #tpu.pipeline_mode<synchronous>, transform_indices = @transform_1, window_bounds = array<i64: 48, 128>}, {transform_indices = @transform_2, window_bounds = array<i64: 8, 128>}]} {
    %c0 = arith.constant 0 : index
    %c0_0 = arith.constant 0 : index
    %0 = vector.load %arg1[%c0, %c0_0] : memref<8x128xf32, #tpu.memory_space<vmem>>, vector<8x128xf32>
    %1 = tpu.iota {dimensions = array<i32: 1>} : vector<8x128xi32>
    %c0_i32 = arith.constant 0 : i32
    %2 = vector.broadcast %c0_i32 : i32 to vector<8x128xi32>
    %3 = arith.cmpi eq, %1, %2 : vector<8x128xi32>
    %cst = arith.constant 0.000000e+00 : f32
    %4 = vector.broadcast %cst : f32 to vector<8x128xf32>
    %5 = arith.select %3, %0, %4 : vector<8x128xi1>, vector<8x128xf32>
    %cst_1 = arith.constant dense<0.000000e+00> : vector<8xf32>
    %6 = vector.multi_reduction <add>, %5, %cst_1 [1] : vector<8x128xf32> to vector<8xf32>
    %7 = vector.shape_cast %6 : vector<8xf32> to vector<8x1xf32>
    %c1_i32 = arith.constant 1 : i32
    %8 = vector.broadcast %c1_i32 : i32 to vector<8x128xi32>
    %9 = arith.cmpi eq, %1, %8 : vector<8x128xi32>
    %cst_2 = arith.constant 0.000000e+00 : f32
    %10 = vector.broadcast %cst_2 : f32 to vector<8x128xf32>
    %11 = arith.select %9, %0, %10 : vector<8x128xi1>, vector<8x128xf32>
    %cst_3 = arith.constant dense<0.000000e+00> : vector<8xf32>
    %12 = vector.multi_reduction <add>, %11, %cst_3 [1] : vector<8x128xf32> to vector<8xf32>
    %13 = vector.shape_cast %12 : vector<8xf32> to vector<8x1xf32>
    %c2_i32 = arith.constant 2 : i32
    %14 = vector.broadcast %c2_i32 : i32 to vector<8x128xi32>
    %15 = arith.cmpi eq, %1, %14 : vector<8x128xi32>
    %cst_4 = arith.constant 0.000000e+00 : f32
    %16 = vector.broadcast %cst_4 : f32 to vector<8x128xf32>
    %17 = arith.select %15, %0, %16 : vector<8x128xi1>, vector<8x128xf32>
    %cst_5 = arith.constant dense<0.000000e+00> : vector<8xf32>
    %18 = vector.multi_reduction <add>, %17, %cst_5 [1] : vector<8x128xf32> to vector<8xf32>
    %19 = vector.shape_cast %18 : vector<8xf32> to vector<8x1xf32>
    %c0_6 = arith.constant 0 : index
    %c0_7 = arith.constant 0 : index
    %20 = vector.load %arg2[%c0_6, %c0_7] : memref<48x128xf32, #tpu.memory_space<vmem>>, vector<1x128xf32>
    %c1 = arith.constant 1 : index
    %c0_8 = arith.constant 0 : index
    %21 = vector.load %arg2[%c1, %c0_8] : memref<48x128xf32, #tpu.memory_space<vmem>>, vector<1x128xf32>
    %c2 = arith.constant 2 : index
    %c0_9 = arith.constant 0 : index
    %22 = vector.load %arg2[%c2, %c0_9] : memref<48x128xf32, #tpu.memory_space<vmem>>, vector<1x128xf32>
    %23 = vector.broadcast %7 : vector<8x1xf32> to vector<8x128xf32>
    %24 = vector.broadcast %20 : vector<1x128xf32> to vector<8x128xf32>
    %25 = arith.mulf %23, %24 : vector<8x128xf32>
    %26 = vector.broadcast %13 : vector<8x1xf32> to vector<8x128xf32>
    %27 = vector.broadcast %21 : vector<1x128xf32> to vector<8x128xf32>
    %28 = arith.mulf %26, %27 : vector<8x128xf32>
    %29 = arith.addf %25, %28 : vector<8x128xf32>
    %30 = vector.broadcast %22 : vector<1x128xf32> to vector<8x128xf32>
    %31 = arith.addf %29, %30 : vector<8x128xf32>
    %32 = math.tanh %31 : vector<8x128xf32>
    %c8 = arith.constant 8 : index
    %c0_10 = arith.constant 0 : index
    %33 = vector.load %arg2[%c8, %c0_10] : memref<48x128xf32, #tpu.memory_space<vmem>>, vector<32x128xf32>
    %c3 = arith.constant 3 : index
    %c0_11 = arith.constant 0 : index
    %34 = vector.load %arg2[%c3, %c0_11] : memref<48x128xf32, #tpu.memory_space<vmem>>, vector<1x128xf32>
    %35 = vector.extract_strided_slice %32 {offsets = [0, 0], sizes = [8, 32], strides = [1, 1]} : vector<8x128xf32> to vector<8x32xf32>
    %cst_12 = arith.constant dense<0.000000e+00> : vector<8x128xf32>
    %36 = tpu.matmul %35, %33, %cst_12 {dimension_numbers = #tpu.dot_dimension_numbers<[1], [0], [0], [1], [0, 0, 1, 1], [], []>} : vector<8x32xf32>, vector<32x128xf32>, vector<8x128xf32> -> vector<8x128xf32>
    %37 = vector.broadcast %34 : vector<1x128xf32> to vector<8x128xf32>
    %38 = arith.addf %36, %37 : vector<8x128xf32>
    %39 = math.tanh %38 : vector<8x128xf32>
    %c40 = arith.constant 40 : index
    %c0_13 = arith.constant 0 : index
    %40 = vector.load %arg2[%c40, %c0_13] : memref<48x128xf32, #tpu.memory_space<vmem>>, vector<8x128xf32>
    %c4 = arith.constant 4 : index
    %c0_14 = arith.constant 0 : index
    %41 = vector.load %arg2[%c4, %c0_14] : memref<48x128xf32, #tpu.memory_space<vmem>>, vector<1x128xf32>
    %42 = vector.extract_strided_slice %39 {offsets = [0, 0], sizes = [8, 8], strides = [1, 1]} : vector<8x128xf32> to vector<8x8xf32>
    %cst_15 = arith.constant dense<0.000000e+00> : vector<8x128xf32>
    %43 = tpu.matmul %42, %40, %cst_15 {dimension_numbers = #tpu.dot_dimension_numbers<[1], [0], [0], [1], [0, 0, 1, 1], [], []>} : vector<8x8xf32>, vector<8x128xf32>, vector<8x128xf32> -> vector<8x128xf32>
    %44 = vector.broadcast %41 : vector<1x128xf32> to vector<8x128xf32>
    %45 = arith.addf %43, %44 : vector<8x128xf32>
    %c0_i32_16 = arith.constant 0 : i32
    %46 = vector.broadcast %c0_i32_16 : i32 to vector<8x128xi32>
    %47 = arith.cmpi eq, %1, %46 : vector<8x128xi32>
    %cst_17 = arith.constant 0.000000e+00 : f32
    %48 = vector.broadcast %cst_17 : f32 to vector<8x128xf32>
    %49 = arith.select %47, %45, %48 : vector<8x128xi1>, vector<8x128xf32>
    %cst_18 = arith.constant dense<0.000000e+00> : vector<8xf32>
    %50 = vector.multi_reduction <add>, %49, %cst_18 [1] : vector<8x128xf32> to vector<8xf32>
    %51 = vector.shape_cast %50 : vector<8xf32> to vector<8x1xf32>
    %c1_i32_19 = arith.constant 1 : i32
    %52 = vector.broadcast %c1_i32_19 : i32 to vector<8x128xi32>
    %53 = arith.cmpi eq, %1, %52 : vector<8x128xi32>
    %cst_20 = arith.constant 0.000000e+00 : f32
    %54 = vector.broadcast %cst_20 : f32 to vector<8x128xf32>
    %55 = arith.select %53, %45, %54 : vector<8x128xi1>, vector<8x128xf32>
    %cst_21 = arith.constant dense<0.000000e+00> : vector<8xf32>
    %56 = vector.multi_reduction <add>, %55, %cst_21 [1] : vector<8x128xf32> to vector<8xf32>
    %57 = vector.shape_cast %56 : vector<8xf32> to vector<8x1xf32>
    %58 = arith.mulf %57, %19 : vector<8x1xf32>
    %59 = arith.addf %51, %58 : vector<8x1xf32>
    %60 = arith.mulf %19, %19 : vector<8x1xf32>
    %cst_22 = arith.constant -5.000000e-01 : f32
    %61 = vector.broadcast %cst_22 : f32 to vector<8x1xf32>
    %62 = arith.mulf %61, %60 : vector<8x1xf32>
    %63 = math.absf %57 : vector<8x1xf32>
    %64 = math.log %63 : vector<8x1xf32>
    %65 = arith.subf %62, %64 : vector<8x1xf32>
    %cst_23 = arith.constant 0.918938517 : f32
    %66 = vector.broadcast %cst_23 : f32 to vector<8x1xf32>
    %67 = arith.subf %65, %66 : vector<8x1xf32>
    %c0_i32_24 = arith.constant 0 : i32
    %68 = vector.broadcast %c0_i32_24 : i32 to vector<8x128xi32>
    %69 = arith.cmpi eq, %1, %68 : vector<8x128xi32>
    %c1_i32_25 = arith.constant 1 : i32
    %70 = vector.broadcast %c1_i32_25 : i32 to vector<8x128xi32>
    %71 = arith.cmpi eq, %1, %70 : vector<8x128xi32>
    %72 = vector.shape_cast %67 : vector<8x1xf32> to vector<8x1xf32>
    %73 = vector.broadcast %72 : vector<8x1xf32> to vector<8x128xf32>
    %74 = arith.select %71, %73, %45 : vector<8x128xi1>, vector<8x128xf32>
    %75 = vector.shape_cast %59 : vector<8x1xf32> to vector<8x1xf32>
    %76 = vector.broadcast %75 : vector<8x1xf32> to vector<8x128xf32>
    %77 = arith.select %69, %76, %74 : vector<8x128xi1>, vector<8x128xf32>
    %c0_26 = arith.constant 0 : index
    %c0_27 = arith.constant 0 : index
    %78 = vector.load %arg3[%c0_26, %c0_27] : memref<8x128xf32, #tpu.memory_space<vmem>>, vector<8x128xf32>
    tpu.vector_store %arg3[%c0_26, %c0_27], %77 {strides = array<i32>} : memref<8x128xf32, #tpu.memory_space<vmem>>, vector<8x128xf32>,
    return
  }
  func.func @transform_0(%arg0: i32) -> (i32, i32) {
    %c0_i32 = arith.constant 0 : i32
    %c0_i32_0 = arith.constant 0 : i32
    return %arg0, %c0_i32 : i32, i32
  }
  func.func @transform_1(%arg0: i32) -> (i32, i32) {
    %c0_i32 = arith.constant 0 : i32
    %c0_i32_0 = arith.constant 0 : i32
    %c0_i32_1 = arith.constant 0 : i32
    return %c0_i32, %c0_i32_0 : i32, i32
  }
  func.func @transform_2(%arg0: i32) -> (i32, i32) {
    %c0_i32 = arith.constant 0 : i32
    %c0_i32_0 = arith.constant 0 : i32
    return %arg0, %c0_i32 : i32, i32
  }
}

</mosaic_0001>

<bundles_post_ra>
// kernel: actor_critic_forward.1
= control target key start
LH: loop header
LB: loop body
LE: loop exit
PB: predicated region body
PF: predicated region fallthrough
CT: control target
= control target key end

     0   :  { %s498_s9 = smov 0   ;;  %s569_s0 = inlined_call_operand.vmem [shape: f32[16,128], index: 0, kind: input, shape index: {}]   ;;  %s570_s1 = inlined_call_operand.vmem [shape: f32[48,128], index: 1, kind: input, shape index: {}]   ;;  %s571_s2 = inlined_call_operand.vmem [shape: f32[16,128], index: 2, kind: output, shape index: {}]  }
   0x1 LB: > { %s409_s10 = sadd.s32 4294967295, %s478_s9   ;;  %p413_p0 = scmp.ge.s32.totalorder %s478_s9, 1  ;;  %s478_s9 = sphi %s498_s9, %s12_s9  }
   0x2   : > { %p111_p1 = scmp.lt.s32.totalorder %s478_s9, 3 }
   0x4   : > { %p112_p2 = pnand %p413_p0, %p111_p1 }
   0x5   : > { %p131_p3 = scmp.lt.s32.totalorder (!%p112_p2), %s409_s10, 1  ;;  %v140_v0 = vlaneseq (!%p112_p2)  ;;  %v174_v5 = vld [vmem:[%s570_s1 + $0x8] sm:$0xff] (!%p112_p2)  ;;  %v175_v6 = vld [vmem:[%s570_s1 + $0x10] sm:$0xff] (!%p112_p2)  ;;  %v176_v7 = vld [vmem:[%s570_s1 + $0x18] sm:$0xff] (!%p112_p2)  ;;  %v480_v8 = vmov (!%p112_p2), 0.0|0.0   ;;  %vm481_vm2 = vmmov (!%p112_p2), 0  }
   0x6   : > { %115 = sbr.rel (%p112_p2) target bundleno = 785 (0x311), region = 28  ;;  %449 = vmatprep.subr.bf16.mxu0 (!%p112_p2), %v480_v8  ;;  %v450_v9 = vpack.c.bf16 (!%p112_p2), %v175_v6, %v174_v5  ;;  %v177_v10 = vld [vmem:[%s570_s1 + $0x20] sm:$0xff] (!%p112_p2)  ;;  %v482_v11 = vmov (!%p112_p2), 0.0   ;;  %vm183_vm3 = vcmask (!%p112_p2), 261120   ;;  %v258_v23 = vld [vmem:[%s570_s1 + $0x28] sm:$0xff] (!%p112_p2)  ;;  %vm264_vm4 = vcmask (!%p112_p2), 64512  }
   0x7   : > { %v508_v1 = vand.u32 (!%p112_p2), 127, %v140_v0  ;;  %441 = vmatprep.mubr.msk.f32.mxu0 (!%p112_p2), %vm481_vm2, %v482_v11  ;;  %444 = vmatprep.subr.mxu1 (!%p112_p2), %v482_v11  ;;  %v453_v12 = vpack.c.bf16 (!%p112_p2), %v177_v10, %v176_v7  ;;  %v416_v14 = vld [vmem:[%s570_s1] ss:$0 sm:$0xff] (!%p112_p2)  ;;  %v417_v15 = vld [vmem:[%s570_s1 + $0x1] ss:$0 sm:$0xff] (!%p112_p2) }
   0x8   : > { %446 = vmatprep.mubr.msk.f32.mxu1 (!%p112_p2), %vm481_vm2, %v482_v11  ;;  %451 = vmatpush3.bf16.msra.mxu0 (!%p112_p2), %v450_v9  ;;  %v418_v19 = vld [vmem:[%s570_s1 + $0x2] ss:$0 sm:$0xff] (!%p112_p2)  ;;  %v419_v24 = vld [vmem:[%s570_s1 + $0x3] ss:$0 sm:$0xff] (!%p112_p2)  ;;  %v421_v29 = vld [vmem:[%s570_s1 + $0x4] ss:$0 sm:$0xff] (!%p112_p2) }
   0x9   : > { %vm142_vm0 = vcmp.eq.s32.totalorder (!%p112_p2), %v508_v1, 0  ;;  %vm146_vm1 = vcmp.eq.s32.totalorder (!%p112_p2), %v508_v1, 1  ;;  %452 = vmatprep.subr.bf16.mxu0 (!%p112_p2), %v480_v8  ;;  %445 = vmatpush3.msra.mxu1 (!%p112_p2), %v258_v23  ;;  %vm150_vm5 = vcmp.eq.s32.totalorder (!%p112_p2), %v508_v1, 2 }
   0xc   : > { %454 = vmatpush3.bf16.msra.mxu0 (!%p112_p2), %v453_v12 }
   0xd   : > { %s573_s10 = smov (!%p131_p3, %s409_s10), 1 }
   0xe   : > { %s414_s11 = sshll.u32 %s573_s10, 3 }
   0xf   : > { %s134_s14 = scalar_lea.vmem %s569_s0, %s414_s11  ;;  %s138_s12 = scalar_lea.vmem %s571_s2, %s414_s11 }
  0x10   : > { %v139_v2 = vld [vmem:[%s134_s14] sm:$0xff] }
  0x11   : > { %v143_v3 = vsel %vm142_vm0, %v139_v2, 0.0  ;;  %v147_v4 = vsel %vm146_vm1, %v139_v2, 0.0  ;;  %v151_v35 = vsel %vm150_vm5, %v139_v2, 0.0 }
  0x12   : > { %144 = vadd.xlane.f32.xlu0 %v143_v3 }
  0x16   : > { %148 = vadd.xlane.f32.xlu0 %v147_v4 }
  0x9f   : > { %v145_v13 = vpop.xlane.xlu0 %144 }
  0xa0   : > { %v161_v17 = vmul.f32 %v416_v14, %v145_v13 }
  0xa3   : > { %v149_v16 = vpop.xlane.xlu0 %148 }
  0xa4   : > { %v166_v18 = vmul.f32 %v417_v15, %v149_v16 }
  0xa6   : > { %v167_v20 = vadd.f32 %v166_v18, %v161_v17 }
  0xa8   : > { %v172_v21 = vadd.f32 %v418_v19, %v167_v20 }
  0xaa   : > { %466 = vtanh.f32 %v172_v21 }
  0xb4   : > { %v467_v22 = vpop.eup %466 }
  0xb5   : > { %442 = vmatmul.mubr.msk.f32.vlgmr.msra.gmra.mrb[0].mxu0 %vm183_vm3, %v467_v22 }
 0x188   : > { %v253_v25 = vpop.f32.mrb[0].mxu0 }
 0x189   : > { %v254_v26 = vadd.f32 %v419_v24, %v253_v25  ;;  %v443_v27 = vpop.f32.mrb[1].mxu0 }
 0x18b   : > { %468 = vtanh.f32 %v254_v26 }
 0x195   : > { %v469_v28 = vpop.eup %468 }
 0x196   : > { %447 = vmatmul.mubr.msk.f32.vlgmr.msra.gmra.mrb[0].mxu1 %vm264_vm4, %v469_v28 }
 0x269   : > { %v334_v30 = vpop.f32.mrb[0].mxu1 }
 0x26a   : > { %v335_v31 = vadd.f32 %v421_v29, %v334_v30  ;;  %v448_v32 = vpop.f32.mrb[1].mxu1 }
 0x26c   : > { %v341_v33 = vsel %vm146_vm1, %v335_v31, 0.0  ;;  %v338_v34 = vsel %vm142_vm0, %v335_v31, 0.0 }
 0x26d   : > { %342 = vadd.xlane.f32.xlu1 %v341_v33  ;;  %339 = vadd.xlane.f32.xlu0 %v338_v34 }
 0x271   : > { %152 = vadd.xlane.f32.xlu1 %v151_v35 }
 0x2fa   : > { %v343_v36 = vpop.xlane.xlu1 %342  ;;  %v340_v45 = vpop.xlane.xlu0 %339 }
 0x2fb   : > { %v348_v37 = vand.u32 2147483647, %v343_v36 }
 0x2fd   : > { %470 = vlog2.f32 %v348_v37 }
 0x2fe   : > { %v153_v38 = vpop.xlane.xlu1 %152 }
 0x2ff   : > { %v346_v39 = vmul.f32 %v153_v38, %v153_v38  ;;  %v344_v43 = vmul.f32 %v343_v36, %v153_v38 }
 0x301   : > { %v347_v40 = vmul.f32 -0.5, %v346_v39  ;;  %v345_v47 = vadd.f32 %v344_v43, %v340_v45 }
 0x307   : > { %v471_v41 = vpop.eup %470 }
 0x308   : > { %v350_v42 = vmul.f32 0.6931472, %v471_v41 }
 0x30a   : > { %v351_v44 = vsub.f32 %v347_v40, %v350_v42 }
 0x30c   : > { %v423_v46 = vadd.f32 -0.9189385, %v351_v44 }
 0x30e   : > { %v353_v48 = vsel %vm146_vm1, %v423_v46, %v335_v31 }
 0x30f   : > { %v354_v49 = vsel %vm142_vm0, %v345_v47, %v353_v48 }
 0x310   : > { %355 = vst [vmem:[%s138_s12] sm:$0xff] %v354_v49 }
 0x311 PF: > { %s12_s9 = sadd.s32 1, %s478_s9  }
 0x312   : > { %p9_p4 = scmp.ge.s32.totalorder %s12_s9, 4  }
 0x314   :  { %11 = sbr.rel (!%p9_p4) target bundleno = 1 (0x1), region = 58 }

</bundles_post_ra>
